<compile_context>
chip_gen: v7x
topology: tpu7x:2x2x1
jax: 0.10.0
libtpu: 0.0.40
codegen_flags: <defaults>
</compile_context>

<pallas_src>
import jax
import jax.numpy as jnp
from jax.experimental import pallas as pl
from jax.experimental.pallas import tpu as pltpu


# ---------------------------------------------------------------------------
# Parameter packing: one zero-padded slab, feature-major (PyTorch (out, in))
# layout so the kernel computes h^T = W @ h_prev^T directly.
#   rows   0: 24  -> W1  (18,16) zero-padded          cols 0:16
#   rows  24: 48  -> W2  (18,18) zero-padded          cols 0:24
#   rows  48: 72  -> W3  (18,18) zero-padded          cols 0:24
#   rows  72: 80  -> W4  (1,18)  zero-padded          cols 0:24 (row 72 only)
#   rows  80:104  -> biases as columns: col0=b1, col1=b2, col2=b3, col3=[b4,0..]
# ---------------------------------------------------------------------------
_SLAB_ROWS = 104
_SLAB_COLS = 24


def _round_up(n, m):
    return ((n + m - 1) // m) * m


def pack_params(params, dtype=jnp.float32):
    slab = jnp.zeros((_SLAB_ROWS, _SLAB_COLS), jnp.float32)
    slab = slab.at[0:18, 0:16].set(params["w1"])     # (18, 16)
    slab = slab.at[24:42, 0:18].set(params["w2"])    # (18, 18)
    slab = slab.at[48:66, 0:18].set(params["w3"])    # (18, 18)
    slab = slab.at[72:73, 0:18].set(params["w4"])    # (1, 18)
    slab = slab.at[80:98, 0].set(params["b1"])       # (18,)
    slab = slab.at[80:98, 1].set(params["b2"])
    slab = slab.at[80:98, 2].set(params["b3"])
    slab = slab.at[80:81, 3].set(params["b4"])       # (1,)
    return slab.astype(dtype)


def mlp_kernel(x_ref, w_ref, o_ref):
    f32 = jnp.float32
    cdt = x_ref.dtype                                  # MXU compute dtype
    x = x_ref[...]                                     # (TB, 16)

    bias = w_ref[80:104, 0:4].astype(f32)              # (24, 4)
    b1 = bias[:, 0:1]                                  # (24, 1), pad rows = 0
    b2 = bias[:, 1:2]
    b3 = bias[:, 2:3]
    b4 = bias[0:1, 3:4]                                # (1, 1)

    # Layer 1: (24,16) . (TB,16)^T -> (24, TB); feature-major from here on.
    h = jax.lax.dot_general(
        w_ref[0:24, 0:16], x, (((1,), (1,)), ((), ())),
        preferred_element_type=f32)
    h = jnp.maximum(h + b1, 0.0).astype(cdt)           # (24, TB)

    # Layers 2 and 3: (24,24) @ (24,TB) -> (24,TB); zero pad rows/cols stay 0.
    h = jnp.dot(w_ref[24:48, 0:24], h, preferred_element_type=f32)
    h = jnp.maximum(h + b2, 0.0).astype(cdt)
    h = jnp.dot(w_ref[48:72, 0:24], h, preferred_element_type=f32)
    h = jnp.maximum(h + b3, 0.0).astype(cdt)

    # Layer 4: padded (8,24) @ (24,TB); only row 0 is the real output row.
    z = jnp.dot(w_ref[72:80, 0:24], h, preferred_element_type=f32)
    z = z[0:1, :] + b4                                 # (1, TB), lane-dense
    o_ref[...] = (jax.nn.sigmoid(z) * 7.0).astype(o_ref.dtype)


def _pick_tile(B, tile_b):
    """Batch tile: multiple of 128 when multi-tile (lane-aligned output blocks),
    full padded batch when a single tile suffices; split so G >= 2 for
    mid/large batches (v7x megacore)."""
    B8 = _round_up(max(B, 1), 8)
    if B8 <= tile_b:
        if B8 <= 1024:
            return B8                     # single tile; blocks = full array dims
        g = 2                             # give both v7x TensorCores a tile
    else:
        g = pl.cdiv(B8, tile_b)
    return _round_up(pl.cdiv(B8, g), 128)


def neural_network_forward(x, params, *, tile_b=2048):
    """x: (B, 16) f32 or bf16. Returns (B, 1), matching the PyTorch forward."""
    B, F = x.shape
    assert F == 16, "NeuralNetwork expects 16 input features"

    slab = pack_params(params, x.dtype)   # tiny (~10 KiB); resident in VMEM

    TB = _pick_tile(B, tile_b)
    B_pad = _round_up(B, TB)
    if B_pad != B:
        x = jnp.pad(x, ((0, B_pad - B), (0, 0)))   # zero tail rows, sliced off
    G = B_pad // TB

    out_row = pl.pallas_call(
        mlp_kernel,
        out_shape=jax.ShapeDtypeStruct((1, B_pad), x.dtype),
        grid=(G,),
        in_specs=[
            pl.BlockSpec((TB, 16), lambda i: (i, 0)),        # batch-tiled x
            pl.BlockSpec(slab.shape, lambda i: (0, 0)),      # resident weights
        ],
        out_specs=pl.BlockSpec((1, TB), lambda i: (0, i)),   # lane-dense row
        compiler_params=pltpu.CompilerParams(
            dimension_semantics=("parallel",),               # megacore sharding
        ),
    )(x, slab)

    # (1, B_pad) -> (B_pad, 1) keeps the same linear order (cheap reshape).
    out = out_row.reshape(B_pad, 1)
    return out[:B] if B_pad != B else out


# ---------------------------------------------------------------------------
# Deterministic init (PyTorch nn.Linear orientation: W (out,in), b (out,))
# and a pure-JAX reference forward for correctness checking.
# ---------------------------------------------------------------------------
def init_params(key):
    ks = jax.random.split(key, 8)

    def linear(kw, kb, fan_in, fan_out):
        bound = 1.0 / float(fan_in) ** 0.5
        w = jax.random.uniform(kw, (fan_out, fan_in), jnp.float32, -bound, bound)
        b = jax.random.uniform(kb, (fan_out,), jnp.float32, -bound, bound)
        return w, b

    w1, b1 = linear(ks[0], ks[1], 16, 18)
    w2, b2 = linear(ks[2], ks[3], 18, 18)
    w3, b3 = linear(ks[4], ks[5], 18, 18)
    w4, b4 = linear(ks[6], ks[7], 18, 1)
    return dict(w1=w1, b1=b1, w2=w2, b2=b2, w3=w3, b3=b3, w4=w4, b4=b4)


def reference_forward(x, p):
    h = jnp.maximum(x @ p["w1"].T + p["b1"], 0.0)
    h = jnp.maximum(h @ p["w2"].T + p["b2"], 0.0)
    h = jnp.maximum(h @ p["w3"].T + p["b3"], 0.0)
    z = h @ p["w4"].T + p["b4"]
    return jax.nn.sigmoid(z) * 7.0


if __name__ == "__main__":
    key = jax.random.PRNGKey(0)
    k_params, k_x = jax.random.split(key)
    k1, k2, k3 = jax.random.split(k_x, 3)
    params = init_params(k_params)

    # Single-tile path (G = 1, full-dim blocks).
    x1 = jax.random.normal(k1, (8, 16), dtype=jnp.float32)
    y1 = jax.block_until_ready(neural_network_forward(x1, params))
    r1 = reference_forward(x1, params)
    assert y1.shape == (8, 1)
    assert jnp.allclose(y1, r1, atol=2e-2, rtol=1e-2)

    # Multi-tile grid with tail padding (TB = 128, G = 3, 84 padded rows).
    x2 = jax.random.normal(k2, (300, 16), dtype=jnp.float32)
    y2 = jax.block_until_ready(neural_network_forward(x2, params, tile_b=128))
    r2 = reference_forward(x2, params)
    assert y2.shape == (300, 1)
    assert jnp.allclose(y2, r2, atol=2e-2, rtol=1e-2)

    # Default large-tile path exercising the >=2-grid-step (megacore) split.
    x3 = jax.random.normal(k3, (1200, 16), dtype=jnp.float32)
    y3 = jax.block_until_ready(neural_network_forward(x3, params))
    r3 = reference_forward(x3, params)
    assert y3.shape == (1200, 1)
    assert jnp.allclose(y3, r3, atol=2e-2, rtol=1e-2)

    print("KERNEL_OK")
</pallas_src>

<mosaic_0001>
module attributes {stable_mosaic.version = 11 : i64} {
  func.func @mlp_kernel(%arg0: i32, %arg1: memref<8x16xf32, #tpu.memory_space<vmem>>, %arg2: memref<104x24xf32, #tpu.memory_space<vmem>>, %arg3: memref<1x8xf32, #tpu.memory_space<vmem>>) attributes {dimension_semantics = [#tpu.dimension_semantics<parallel>], iteration_bounds = array<i64: 1>, scalar_prefetch = 0 : i64, scratch_operands = 0 : i64, tpu.core_type = #tpu.core_type<tc>, window_params = [{transform_indices = @transform_0, window_bounds = array<i64: 8, 16>}, {pipeline_mode = #tpu.pipeline_mode<synchronous>, transform_indices = @transform_1, window_bounds = array<i64: 104, 24>}, {transform_indices = @transform_2, window_bounds = array<i64: 1, 8>}]} {
    %c0 = arith.constant 0 : index
    %c0_0 = arith.constant 0 : index
    %0 = vector.load %arg1[%c0, %c0_0] : memref<8x16xf32, #tpu.memory_space<vmem>>, vector<8x16xf32>
    %c80 = arith.constant 80 : index
    %c0_1 = arith.constant 0 : index
    %1 = vector.load %arg2[%c80, %c0_1] : memref<104x24xf32, #tpu.memory_space<vmem>>, vector<24x4xf32>
    %2 = vector.extract_strided_slice %1 {offsets = [0, 0], sizes = [24, 1], strides = [1, 1]} : vector<24x4xf32> to vector<24x1xf32>
    %3 = vector.extract_strided_slice %1 {offsets = [0, 1], sizes = [24, 1], strides = [1, 1]} : vector<24x4xf32> to vector<24x1xf32>
    %4 = vector.extract_strided_slice %1 {offsets = [0, 2], sizes = [24, 1], strides = [1, 1]} : vector<24x4xf32> to vector<24x1xf32>
    %5 = vector.extract_strided_slice %1 {offsets = [0, 3], sizes = [1, 1], strides = [1, 1]} : vector<24x4xf32> to vector<1x1xf32>
    %c0_2 = arith.constant 0 : index
    %c0_3 = arith.constant 0 : index
    %6 = vector.load %arg2[%c0_2, %c0_3] : memref<104x24xf32, #tpu.memory_space<vmem>>, vector<24x16xf32>
    %cst = arith.constant dense<0.000000e+00> : vector<24x8xf32>
    %7 = tpu.matmul %6, %0, %cst {dimension_numbers = #tpu.dot_dimension_numbers<[1], [1], [0], [0], [0, 0, 1, 0], [], []>} : vector<24x16xf32>, vector<8x16xf32>, vector<24x8xf32> -> vector<24x8xf32>
    %8 = vector.broadcast %2 : vector<24x1xf32> to vector<24x8xf32>
    %9 = arith.addf %7, %8 : vector<24x8xf32>
    %cst_4 = arith.constant 0.000000e+00 : f32
    %10 = vector.broadcast %cst_4 : f32 to vector<24x8xf32>
    %11 = arith.maximumf %9, %10 : vector<24x8xf32>
    %c24 = arith.constant 24 : index
    %c0_5 = arith.constant 0 : index
    %12 = vector.load %arg2[%c24, %c0_5] : memref<104x24xf32, #tpu.memory_space<vmem>>, vector<24x24xf32>
    %cst_6 = arith.constant dense<0.000000e+00> : vector<24x8xf32>
    %13 = tpu.matmul %12, %11, %cst_6 {dimension_numbers = #tpu.dot_dimension_numbers<[1], [0], [0], [1], [0, 0, 1, 1], [], []>} : vector<24x24xf32>, vector<24x8xf32>, vector<24x8xf32> -> vector<24x8xf32>
    %14 = vector.broadcast %3 : vector<24x1xf32> to vector<24x8xf32>
    %15 = arith.addf %13, %14 : vector<24x8xf32>
    %cst_7 = arith.constant 0.000000e+00 : f32
    %16 = vector.broadcast %cst_7 : f32 to vector<24x8xf32>
    %17 = arith.maximumf %15, %16 : vector<24x8xf32>
    %c48 = arith.constant 48 : index
    %c0_8 = arith.constant 0 : index
    %18 = vector.load %arg2[%c48, %c0_8] : memref<104x24xf32, #tpu.memory_space<vmem>>, vector<24x24xf32>
    %cst_9 = arith.constant dense<0.000000e+00> : vector<24x8xf32>
    %19 = tpu.matmul %18, %17, %cst_9 {dimension_numbers = #tpu.dot_dimension_numbers<[1], [0], [0], [1], [0, 0, 1, 1], [], []>} : vector<24x24xf32>, vector<24x8xf32>, vector<24x8xf32> -> vector<24x8xf32>
    %20 = vector.broadcast %4 : vector<24x1xf32> to vector<24x8xf32>
    %21 = arith.addf %19, %20 : vector<24x8xf32>
    %cst_10 = arith.constant 0.000000e+00 : f32
    %22 = vector.broadcast %cst_10 : f32 to vector<24x8xf32>
    %23 = arith.maximumf %21, %22 : vector<24x8xf32>
    %c72 = arith.constant 72 : index
    %c0_11 = arith.constant 0 : index
    %24 = vector.load %arg2[%c72, %c0_11] : memref<104x24xf32, #tpu.memory_space<vmem>>, vector<8x24xf32>
    %cst_12 = arith.constant dense<0.000000e+00> : vector<8x8xf32>
    %25 = tpu.matmul %24, %23, %cst_12 {dimension_numbers = #tpu.dot_dimension_numbers<[1], [0], [0], [1], [0, 0, 1, 1], [], []>} : vector<8x24xf32>, vector<24x8xf32>, vector<8x8xf32> -> vector<8x8xf32>
    %26 = vector.extract_strided_slice %25 {offsets = [0, 0], sizes = [1, 8], strides = [1, 1]} : vector<8x8xf32> to vector<1x8xf32>
    %27 = vector.broadcast %5 : vector<1x1xf32> to vector<1x8xf32>
    %28 = arith.addf %26, %27 : vector<1x8xf32>
    %29 = arith.negf %28 : vector<1x8xf32>
    %30 = math.exp %29 : vector<1x8xf32>
    %cst_13 = arith.constant 1.000000e+00 : f32
    %31 = vector.broadcast %cst_13 : f32 to vector<1x8xf32>
    %32 = arith.addf %31, %30 : vector<1x8xf32>
    %33 = arith.divf %31, %32 : vector<1x8xf32>
    %cst_14 = arith.constant 7.000000e+00 : f32
    %34 = vector.broadcast %cst_14 : f32 to vector<1x8xf32>
    %35 = arith.mulf %33, %34 : vector<1x8xf32>
    %c0_15 = arith.constant 0 : index
    %c0_16 = arith.constant 0 : index
    %36 = vector.load %arg3[%c0_15, %c0_16] : memref<1x8xf32, #tpu.memory_space<vmem>>, vector<1x8xf32>
    tpu.vector_store %arg3[%c0_15, %c0_16], %35 {strides = array<i32>} : memref<1x8xf32, #tpu.memory_space<vmem>>, vector<1x8xf32>,
    return
  }
  func.func @transform_0(%arg0: i32) -> (i32, i32) {
    %c0_i32 = arith.constant 0 : i32
    %c0_i32_0 = arith.constant 0 : i32
    return %arg0, %c0_i32 : i32, i32
  }
  func.func @transform_1(%arg0: i32) -> (i32, i32) {
    %c0_i32 = arith.constant 0 : i32
    %c0_i32_0 = arith.constant 0 : i32
    %c0_i32_1 = arith.constant 0 : i32
    return %c0_i32, %c0_i32_0 : i32, i32
  }
  func.func @transform_2(%arg0: i32) -> (i32, i32) {
    %c0_i32 = arith.constant 0 : i32
    %c0_i32_0 = arith.constant 0 : i32
    return %c0_i32, %arg0 : i32, i32
  }
}

</mosaic_0001>

<bundles_post_ra>
// kernel: tpu_custom_call.1
= control target key start
LH: loop header
LB: loop body
LE: loop exit
PB: predicated region body
PF: predicated region fallthrough
CT: control target
= control target key end

     0   :  { %vm34_vm0 = vcmask 130048   ;;  %v584_v1 = vmov 0.0   ;;  %vm585_vm1 = vmmov 0   ;;  %s704_s0 = inlined_call_operand.vmem [shape: f32[8,16], index: 0, kind: input, shape index: {}]   ;;  %s705_s1 = inlined_call_operand.vmem [shape: f32[104,24], index: 1, kind: input, shape index: {}]   ;;  %s706_s2 = inlined_call_operand.hbm [shape: f32[1,8], index: 2, kind: output, shape index: {}]  }
   0x1   :  { %v12_v0 = vld [vmem:[%s704_s0] sm:$0xff]  ;;  %479 = vmatprep.subr.mxu0 %v584_v1  ;;  %481 = vmatprep.mubr.msk.f32.mxu0 %vm585_vm1, %v584_v1  ;;  %v621_v3 = vld [vmem:[%s705_s1 + $0x50] sm:$0xff] }
   0x2   :  { %480 = vmatpush3.xpose.msk.msra.mxu0 %vm34_vm0, %v12_v0  ;;  %v16_v2 = vld [vmem:[%s705_s1] sm:$0xff]  ;;  %538 = vmatprep.subr.mxu1 %v584_v1 }
   0x3   :  { %7 = vsyncpa [#allocation3], 0  ;;  %539 = vmatpush3.xpose.msk.msra.mxu1 %vm34_vm0, %v12_v0  ;;  %487 = vmatprep.mubr.msk.f32.mxu1 %vm585_vm1, %v584_v1  ;;  %v18_v4 = vld [vmem:[%s705_s1 + $0x10] sm:$0xff]  ;;  %v586_v5 = vmov 0   ;;  %v15_v6 = vld [vmem:[%s705_s1 + $0x60] sm:$0xff]  ;;  %v587_v9 = vmov 0.0|0.0  }
   0x4   :  { %548 = vset.pattern.permute.xlu0 %v586_v5  ;;  %549 = vset.pattern.permute.xlu1 %v586_v5  ;;  %v17_v7 = vld [vmem:[%s705_s1 + $0x8] sm:$0xff]  ;;  %v14_v8 = vld [vmem:[%s705_s1 + $0x58] sm:$0xff]  ;;  %v588_v10 = vmov 1   ;;  %vm145_vm2 = vcmask 195584   ;;  %v131_v28 = vld [vmem:[%s705_s1 + $0x20] sm:$0xff]  ;;  %v589_v30 = vmov 2  }
   0x5   :  { %482 = vmatmul.mubr.msk.f32.vlgmr.msra.gmra.mrb[0].mxu0 %vm34_vm0, %v16_v2  ;;  %21 = vperm.xlu0 %548, %v621_v3   ;;  %v130_v27 = vld [vmem:[%s705_s1 + $0x18] sm:$0xff]  ;;  %v132_v29 = vld [vmem:[%s705_s1 + $0x28] sm:$0xff]  ;;  %v238_v47 = vld [vmem:[%s705_s1 + $0x30] sm:$0xff]  ;;  %v590_v50 = vmov 3   ;;  %s591_s8 = smov [#allocation2]   ;;  %vm431_vm3 = vcmask 57344  }
   0x6   :  { %484 = vmatprep.mubr.msk.f32.mxu0 %vm585_vm1, %v584_v1  ;;  %488 = vmatmul.mubr.msk.f32.vlgmr.msra.gmra.mrb[0].mxu1 %vm34_vm0, %v18_v4  ;;  %v239_v48 = vld [vmem:[%s705_s1 + $0x38] sm:$0xff]  ;;  %v240_v49 = vld [vmem:[%s705_s1 + $0x40] sm:$0xff]  ;;  %s439_s9 = sshll.u32 %s591_s8, 4  ;;  %s440_s9 = int_to_ptr.vmem [resolvable:$true] %s439_s9 }
   0x7   :  { %31 = vperm.xlu1 %549, %v15_v6   ;;  %496 = vmatprep.mubr.msk.f32.mxu1 %vm585_vm1, %v584_v1  ;;  %s564_s10 = scalar_lea.vmem %s440_s9, 32  ;;  %p565_p1 = scmp.lt.s32.totalorder %s440_s9, %s440_s9 }
   0x8   :  { %529 = vmatprep.subr.bf16.mxu1 %v587_v9  ;;  %532 = vmatprep.subr.bf16.mxu0 %v587_v9 }
   0x9   :  { %485 = vmatmul.mubr.msk.f32.gmra.mrb[2].mxu0 %vm34_vm0, %v17_v7  ;;  %26 = vperm.xlu0 %548, %v14_v8  }
   0xa   :  { %511 = vmatprep.mubr.msk.f32.mxu0 %vm585_vm1, %v584_v1 }
   0xb   :  { %550 = vset.pattern.permute.xlu1 %v588_v10 }
   0xc   :  { %134 = vperm.xlu1 %550, %v621_v3  }
   0xd   :  { %551 = vset.pattern.permute.xlu0 %v588_v10 }
   0xe   :  { %138 = vperm.xlu0 %551, %v14_v8  }
  0x10   :  { %142 = vperm.xlu1 %550, %v15_v6  }
  0x12   :  { %553 = vset.pattern.permute.xlu0 %v589_v30 }
  0x13   :  { %246 = vperm.xlu0 %553, %v14_v8  }
  0x14   :  { %552 = vset.pattern.permute.xlu1 %v589_v30 }
  0x15   :  { %242 = vperm.xlu1 %552, %v621_v3  }
  0x17   :  { %555 = vset.pattern.permute.xlu0 %v590_v50 }
  0x19   :  { %250 = vperm.xlu1 %552, %v15_v6  }
  0x1d   :  { %554 = vset.pattern.permute.xlu1 %v590_v50 }
  0x1e   :  { %420 = vperm.xlu1 %554, %v621_v3   ;;  %v345_v3 = vld [vmem:[%s705_s1 + $0x48] sm:$0xff]  ;;  %s560_s1 = scalar_lea.vmem %s440_s9, 16 }
  0x1f   :  { %p561_p0 = scmp.ne.s32.totalorder %s440_s9, %s560_s1  ;;  %p566_p2 = scmp.lt.s32.totalorder %s564_s10, %s560_s1 }
  0x21   :  { %p567_p3 = por %p566_p2, %p565_p1 }
  0x23   :  { %p568_p4 = pnand %p567_p3, %p561_p0 }
  0x84   :  { %v22_v11 = vpop.permute.xlu0 %21 }
  0x86   :  { %v32_v17 = vpop.permute.xlu1 %31 }
  0x88   :  { %v27_v18 = vpop.permute.xlu0 %26 }
  0x8b   :  { %v135_v31 = vpop.permute.xlu1 %134 }
  0x8d   :  { %v139_v34 = vpop.permute.xlu0 %138 }
  0x8f   :  { %v143_v41 = vpop.permute.xlu1 %142 }
  0x92   :  { %v247_v54 = vpop.permute.xlu0 %246 }
  0x94   :  { %v243_v51 = vpop.permute.xlu1 %242 }
  0x98   :  { %v251_v61 = vpop.permute.xlu1 %250 }
  0x9d   :  { %v421_v5 = vpop.permute.xlu1 %420 }
  0xd8   :  { %v113_v12 = vpop.f32.mrb[0].mxu0 }
  0xd9   :  { %v483_v13 = vpop.f32.mrb[1].mxu0  ;;  %v123_v14 = vpop.f32.mrb[0].mxu1  ;;  %v114_v16 = vadd.f32 %v113_v12, %v22_v11 }
  0xda   :  { %v489_v15 = vpop.f32.mrb[1].mxu1  ;;  %v124_v24 = vadd.f32 %v123_v14, %v32_v17 }
  0xdb   :  { %v127_v22 = vmax.f32 %v114_v16, 0.0 }
  0xdc   :  { %v118_v19 = vpop.f32.mrb[2].mxu0  ;;  %v129_v26 = vmax.f32 %v124_v24, 0.0 }
  0xdd   :  { %v119_v20 = vadd.f32 %v118_v19, %v27_v18  ;;  %v486_v21 = vpop.f32.mrb[3].mxu0 }
  0xdf   :  { %v128_v23 = vmax.f32 %v119_v20, 0.0 }
  0xe1   :  { %v530_v25 = vpack.c.bf16 %v128_v23, %v127_v22 }
  0xe3   :  { %531 = vmatpush3.bf16.msra.mxu1 %v530_v25 }
  0xe4   :  { %494 = vmatprep.subr.mxu1 %v584_v1 }
  0xe7   :  { %495 = vmatpush3.msra.mxu1 %v129_v26 }
  0xe8   :  { %497 = vmatmul.mubr.msk.f32.vlgmr.msra.gmra.mrb[2].mxu1 %vm145_vm2, %v130_v27  ;;  %535 = vmatprep.subr.bf16.mxu1 %v587_v9 }
  0xe9   :  { %499 = vmatprep.mubr.msk.f32.mxu1 %vm585_vm1, %v584_v1 }
  0xec   :  { %500 = vmatmul.mubr.msk.f32.gmra.mrb[4].mxu1 %vm145_vm2, %v131_v28 }
  0xed   :  { %502 = vmatprep.mubr.msk.f32.mxu1 %vm585_vm1, %v584_v1 }
  0xf0   :  { %503 = vmatmul.mubr.msk.f32.gmra.mrb[6].mxu1 %vm145_vm2, %v132_v29 }
  0xf1   :  { %526 = vmatprep.mubr.msk.f32.mxu1 %vm585_vm1, %v584_v1 }
 0x1bb   :  { %v221_v32 = vpop.f32.mrb[2].mxu1 }
 0x1bc   :  { %v498_v33 = vpop.f32.mrb[3].mxu1  ;;  %v222_v35 = vadd.f32 %v221_v32, %v135_v31 }
 0x1be   :  { %v235_v39 = vmax.f32 %v222_v35, 0.0 }
 0x1bf   :  { %v226_v36 = vpop.f32.mrb[4].mxu1 }
 0x1c0   :  { %v227_v37 = vadd.f32 %v226_v36, %v139_v34  ;;  %v501_v38 = vpop.f32.mrb[5].mxu1 }
 0x1c2   :  { %v236_v40 = vmax.f32 %v227_v37, 0.0 }
 0x1c3   :  { %v231_v42 = vpop.f32.mrb[6].mxu1 }
 0x1c4   :  { %v533_v43 = vpack.c.bf16 %v236_v40, %v235_v39  ;;  %v232_v44 = vadd.f32 %v231_v42, %v143_v41  ;;  %v504_v45 = vpop.f32.mrb[7].mxu1 }
 0x1c6   :  { %534 = vmatpush3.bf16.msra.mxu0 %v533_v43  ;;  %v237_v46 = vmax.f32 %v232_v44, 0.0 }
 0x1c7   :  { %509 = vmatprep.subr.mxu0 %v584_v1 }
 0x1ca   :  { %510 = vmatpush3.msra.mxu0 %v237_v46 }
 0x1cb   :  { %512 = vmatmul.mubr.msk.f32.vlgmr.msra.gmra.mrb[4].mxu0 %vm145_vm2, %v238_v47 }
 0x1cc   :  { %514 = vmatprep.mubr.msk.f32.mxu0 %vm585_vm1, %v584_v1 }
 0x1cf   :  { %515 = vmatmul.mubr.msk.f32.gmra.mrb[6].mxu0 %vm145_vm2, %v239_v48 }
 0x1d0   :  { %517 = vmatprep.mubr.msk.f32.mxu0 %vm585_vm1, %v584_v1 }
 0x1d3   :  { %518 = vmatmul.mubr.msk.f32.gmra.mrb[8].mxu0 %vm145_vm2, %v240_v49 }
 0x29e   :  { %v328_v52 = vpop.f32.mrb[4].mxu0 }
 0x29f   :  { %v513_v53 = vpop.f32.mrb[5].mxu0  ;;  %v329_v55 = vadd.f32 %v328_v52, %v243_v51 }
 0x2a1   :  { %v342_v59 = vmax.f32 %v329_v55, 0.0 }
 0x2a2   :  { %v333_v56 = vpop.f32.mrb[6].mxu0 }
 0x2a3   :  { %v334_v57 = vadd.f32 %v333_v56, %v247_v54  ;;  %v516_v58 = vpop.f32.mrb[7].mxu0 }
 0x2a5   :  { %v343_v60 = vmax.f32 %v334_v57, 0.0 }
 0x2a6   :  { %v338_v62 = vpop.f32.mrb[8].mxu0 }
 0x2a7   :  { %v536_v63 = vpack.c.bf16 %v343_v60, %v342_v59  ;;  %v339_v0 = vadd.f32 %v338_v62, %v251_v61  ;;  %v519_v2 = vpop.f32.mrb[9].mxu0 }
 0x2a9   :  { %537 = vmatpush3.bf16.msra.mxu1 %v536_v63  ;;  %v344_v4 = vmax.f32 %v339_v0, 0.0 }
 0x2aa   :  { %524 = vmatprep.subr.mxu1 %v584_v1 }
 0x2ad   :  { %525 = vmatpush3.msra.mxu1 %v344_v4 }
 0x2ae   :  { %527 = vmatmul.mubr.msk.f32.vlgmr.msra.gmra.mrb[8].mxu1 %vm145_vm2, %v345_v3 }
 0x381   :  { %v415_v6 = vpop.f32.mrb[8].mxu1 }
 0x382   :  { %v423_v7 = vadd.f32 %v421_v5, %v415_v6  ;;  %v528_v8 = vpop.f32.mrb[9].mxu1 }
 0x384   :  { %v458_v9 = vmul.f32 -1.442695, %v423_v7 }
 0x386   :  { %556 = vpow2.f32 %v458_v9 }
 0x390   :  { %v557_v10 = vpop.eup %556 }
 0x391   :  { %v427_v11 = vadd.f32 1.0, %v557_v10 }
 0x393   :  { %558 = vrcp.f32 %v427_v11 }
 0x39d   :  { %v559_v1 = vpop.eup %558 }
 0x39e   :  { %v430_v12 = vmul.f32 7.0, %v559_v1 }
 0x3a0   :  { %432 = vst.msk [vmem:[#allocation2] sm:$0x1] %vm431_vm3, %v430_v12 }
 0x3a1   :  { %571 = shalt.err (!%p568_p4)
}
 0x3a2   :  { %s572_s13 = scalar_lea.hbm %s706_s2, 16 }
 0x3a3   :  { %p573_p5 = scmp.ne.s32.totalorder %s706_s2, %s572_s13  ;;  %p576_p6 = scmp.lt.u32.totalorder %s572_s13, %s706_s2 }
 0x3a5   :  { %p578_p7 = pnand %p576_p6, %p573_p5 }
 0x3a7   :  { %581 = shalt.err (!%p578_p7)
}
 0x3a8   :  { %442 = dma.vmem_to_hbm [thread:$0]  %s440_s9, 16, %s706_s2, [#allocation3]  }
 0x3a9   :  { %582 = dma.done.wait [#allocation3], 16  }
 0x3aa   :  { %583 = vsyncadd [#allocation3], 4294967280 }
 0x3ab   :  { %446 = vsyncpa [#allocation3], 1 }

</bundles_post_ra>
